<compile_context>
chip_gen: v5e
topology: v5e:2x2
jax: 0.10.0
libtpu: 0.0.40
codegen_flags: <defaults>
</compile_context>

<pallas_src>
import functools

import jax
import jax.numpy as jnp
from jax.experimental import pallas as pl
from jax.experimental.pallas import tpu as pltpu

_INV_SQRT2 = 0.7071067811865476


def _round_up(a: int, b: int) -> int:
    return (a + b - 1) // b * b


def _mlp_block_kernel(x_ref, w_ref, b_ref, *rest, residual: bool, rlam: float):
    # rest = (xres_ref, o_ref, acc_ref) if residual else (o_ref, acc_ref)
    if residual:
        xres_ref, o_ref, acc_ref = rest
    else:
        o_ref, acc_ref = rest

    k = pl.program_id(2)
    nk = pl.num_programs(2)

    @pl.when(k == 0)
    def _init():
        acc_ref[...] = jnp.zeros_like(acc_ref)

    # x block: (tm, tk); weight block in torch layout: (tn, tk).
    # Contract on dim 1 of both  ->  (tm, tn)  ==  x @ W^T   (no transpose copy).
    acc_ref[...] += jax.lax.dot_general(
        x_ref[...],
        w_ref[...],
        dimension_numbers=(((1,), (1,)), ((), ())),
        preferred_element_type=jnp.float32,
    )

    @pl.when(k == nk - 1)
    def _finalize():
        y = acc_ref[...] + b_ref[...].astype(jnp.float32)
        # Exact GELU (erf form), same as torch.nn.GELU(approximate='none').
        y = 0.5 * y * (1.0 + jax.lax.erf(y * jnp.float32(_INV_SQRT2)))
        if residual:
            y = y + jnp.float32(rlam) * xres_ref[...].astype(jnp.float32)
        o_ref[...] = y.astype(o_ref.dtype)


def mlp_block(x, weight, bias, *, residual: bool = False, rlam: float = 1.0,
              tm: int = 256, tn: int = 256, tk: int = 512,
              compute_dtype=None):
    """MLP_Block forward.

    x:      (M, in_dim)
    weight: (out_dim, in_dim)   -- torch.nn.Linear layout, no transpose needed
    bias:   (out_dim,)
    compute_dtype: optional dtype (e.g. jnp.bfloat16) for the matmul inputs;
                   accumulation / bias / GELU / residual stay in f32.
    """
    M, K = x.shape
    N, K2 = weight.shape
    assert K2 == K, "weight must be (out_dim, in_dim)"
    assert bias.shape == (N,)
    assert tm % 8 == 0 and tn % 128 == 0 and tk % 128 == 0

    if K != N:
        residual = False  # matches the module

    out_dtype = x.dtype

    if compute_dtype is not None:
        x = x.astype(compute_dtype)
        weight = weight.astype(compute_dtype)

    # ---- pad to tile-divisible, lane-dense (multiple-of-128 feature) dims ----
    Mp = _round_up(M, 8)
    tm_eff = min(tm, Mp)
    Mp = _round_up(Mp, tm_eff)

    Kp = _round_up(K, 128)
    tk_eff = min(tk, Kp)
    Kp = _round_up(Kp, tk_eff)

    Np = _round_up(N, 128)
    tn_eff = min(tn, Np)
    Np = _round_up(Np, tn_eff)

    xp = x if (Mp == M and Kp == K) else jnp.pad(x, ((0, Mp - M), (0, Kp - K)))
    wp = weight if (Np == N and Kp == K) else jnp.pad(weight, ((0, Np - N), (0, Kp - K)))
    bp = bias if Np == N else jnp.pad(bias, ((0, Np - N),))
    b2d = bp.reshape(1, Np)

    inputs = [xp, wp, b2d]
    in_specs = [
        pl.BlockSpec((tm_eff, tk_eff), lambda i, j, k: (i, k)),   # X tile
        pl.BlockSpec((tn_eff, tk_eff), lambda i, j, k: (j, k)),   # W tile (torch layout)
        pl.BlockSpec((1, tn_eff), lambda i, j, k: (0, j)),        # bias row tile
    ]
    if residual:
        # Residual needs x sliced along the *output* feature axis -> pad to Np.
        xres = x if (Mp == M and Np == N) else jnp.pad(x, ((0, Mp - M), (0, Np - N)))
        inputs.append(xres)
        in_specs.append(pl.BlockSpec((tm_eff, tn_eff), lambda i, j, k: (i, j)))

    grid = (Mp // tm_eff, Np // tn_eff, Kp // tk_eff)

    # ---- VMEM budget (explicit so v7x's 64 MiB physical is never exceeded) ----
    in_bytes = jnp.dtype(xp.dtype).itemsize
    out_bytes = jnp.dtype(out_dtype).itemsize
    vmem_bytes = (2 * (tm_eff * tk_eff + tn_eff * tk_eff + tn_eff) * in_bytes
                  + 2 * tm_eff * tn_eff * out_bytes
                  + tm_eff * tn_eff * 4)
    if residual:
        vmem_bytes += 2 * tm_eff * tn_eff * in_bytes
    vmem_limit = int(min(max(2 * vmem_bytes, 32 * 1024 * 1024), 48 * 1024 * 1024))

    cost = pl.CostEstimate(
        flops=2 * Mp * Np * Kp,
        transcendentals=Mp * Np,
        bytes_accessed=(Mp * Kp + Np * Kp + Np) * in_bytes + Mp * Np * out_bytes
                       + (Mp * Np * in_bytes if residual else 0),
    )

    kernel = functools.partial(_mlp_block_kernel, residual=residual, rlam=float(rlam))

    out_padded = pl.pallas_call(
        kernel,
        out_shape=jax.ShapeDtypeStruct((Mp, Np), out_dtype),
        grid_spec=pltpu.PrefetchScalarGridSpec(
            num_scalar_prefetch=0,
            grid=grid,
            in_specs=in_specs,
            out_specs=pl.BlockSpec((tm_eff, tn_eff), lambda i, j, k: (i, j)),
            scratch_shapes=[pltpu.VMEM((tm_eff, tn_eff), jnp.float32)],
        ),
        compiler_params=pltpu.CompilerParams(
            dimension_semantics=("parallel", "parallel", "arbitrary"),
            vmem_limit_bytes=vmem_limit,
        ),
        cost_estimate=cost,
    )(*inputs)

    if Mp == M and Np == N:
        return out_padded
    return out_padded[:M, :N]


def _reference(x, weight, bias, residual, rlam):
    y = x @ weight.T + bias
    y = 0.5 * y * (1.0 + jax.lax.erf(y * _INV_SQRT2))
    if residual and x.shape[-1] == weight.shape[0]:
        y = y + rlam * x
    return y


if __name__ == "__main__":
    key = jax.random.PRNGKey(0)
    k1, k2, k3, k4, k5, k6 = jax.random.split(key, 6)

    # Case 1: in_dim == out_dim, residual path exercised (small shapes, padded to 128 lanes).
    batch, in_dim, out_dim = 16, 32, 32
    rlam = 1.0
    x = jax.random.normal(k1, (batch, in_dim), dtype=jnp.float32)
    weight = jax.random.normal(k2, (out_dim, in_dim), dtype=jnp.float32) * 0.05
    bias = jax.random.normal(k3, (out_dim,), dtype=jnp.float32) * 0.01

    out = mlp_block(x, weight, bias, residual=True, rlam=rlam)
    out = jax.block_until_ready(out)
    ref = _reference(x, weight, bias, True, rlam)
    assert out.shape == (batch, out_dim)
    assert jnp.allclose(out, ref, atol=1e-5, rtol=1e-5), "case 1 mismatch vs reference"

    # Case 2: in_dim != out_dim, non-multiple-of-8/128 shapes (exercises padding path).
    batch2, in_dim2, out_dim2 = 10, 48, 96
    x2 = jax.random.normal(k4, (batch2, in_dim2), dtype=jnp.float32)
    weight2 = jax.random.normal(k5, (out_dim2, in_dim2), dtype=jnp.float32) * 0.05
    bias2 = jax.random.normal(k6, (out_dim2,), dtype=jnp.float32) * 0.01

    out2 = mlp_block(x2, weight2, bias2, residual=True)  # residual auto-disabled (dims differ)
    out2 = jax.block_until_ready(out2)
    ref2 = _reference(x2, weight2, bias2, False, 1.0)
    assert out2.shape == (batch2, out_dim2)
    assert jnp.allclose(out2, ref2, atol=1e-5, rtol=1e-5), "case 2 mismatch vs reference"

    print("KERNEL_OK")
</pallas_src>

<mosaic_0001>
module attributes {stable_mosaic.version = 11 : i64} {
  func.func @_mlp_block_kernel(%arg0: i32, %arg1: i32, %arg2: i32, %arg3: memref<16x128xf32, #tpu.memory_space<vmem>>, %arg4: memref<128x128xf32, #tpu.memory_space<vmem>>, %arg5: memref<1x128xf32, #tpu.memory_space<vmem>>, %arg6: memref<16x128xf32, #tpu.memory_space<vmem>>, %arg7: memref<16x128xf32, #tpu.memory_space<vmem>>, %arg8: memref<16x128xf32, #tpu.memory_space<vmem>>) attributes {dimension_semantics = [#tpu.dimension_semantics<parallel>, #tpu.dimension_semantics<parallel>, #tpu.dimension_semantics<arbitrary>], iteration_bounds = array<i64: 1, 1, 1>, scalar_prefetch = 0 : i64, scratch_operands = 1 : i64, tpu.core_type = #tpu.core_type<tc>, window_params = [{transform_indices = @transform_0, window_bounds = array<i64: 16, 128>}, {transform_indices = @transform_1, window_bounds = array<i64: 128, 128>}, {transform_indices = @transform_2, window_bounds = array<i64: 1, 128>}, {transform_indices = @transform_3, window_bounds = array<i64: 16, 128>}, {transform_indices = @transform_4, window_bounds = array<i64: 16, 128>}]} {
    %c0_i32 = arith.constant 0 : i32
    %0 = arith.cmpi eq, %arg2, %c0_i32 : i32
    %1 = arith.extui %0 : i1 to i32
    %c0_i32_0 = arith.constant 0 : i32
    %2 = arith.cmpi ne, %1, %c0_i32_0 : i32
    scf.if %2 {
      %cst_10 = arith.constant 0.000000e+00 : f32
      %12 = vector.broadcast %cst_10 : f32 to vector<16x128xf32>
      %c0_11 = arith.constant 0 : index
      %c0_12 = arith.constant 0 : index
      %13 = vector.load %arg8[%c0_11, %c0_12] : memref<16x128xf32, #tpu.memory_space<vmem>>, vector<16x128xf32>
      tpu.vector_store %arg8[%c0_11, %c0_12], %12 {strides = array<i32>} : memref<16x128xf32, #tpu.memory_space<vmem>>, vector<16x128xf32>,
    } else {
    }
    %c0 = arith.constant 0 : index
    %c0_1 = arith.constant 0 : index
    %3 = vector.load %arg8[%c0, %c0_1] : memref<16x128xf32, #tpu.memory_space<vmem>>, vector<16x128xf32>
    %c0_2 = arith.constant 0 : index
    %c0_3 = arith.constant 0 : index
    %4 = vector.load %arg3[%c0_2, %c0_3] : memref<16x128xf32, #tpu.memory_space<vmem>>, vector<16x128xf32>
    %c0_4 = arith.constant 0 : index
    %c0_5 = arith.constant 0 : index
    %5 = vector.load %arg4[%c0_4, %c0_5] : memref<128x128xf32, #tpu.memory_space<vmem>>, vector<128x128xf32>
    %cst = arith.constant dense<0.000000e+00> : vector<16x128xf32>
    %6 = tpu.matmul %4, %5, %cst {dimension_numbers = #tpu.dot_dimension_numbers<[1], [1], [0], [0], [0, 0, 1, 0], [], []>} : vector<16x128xf32>, vector<128x128xf32>, vector<16x128xf32> -> vector<16x128xf32>
    %7 = arith.addf %3, %6 : vector<16x128xf32>
    %c0_6 = arith.constant 0 : index
    %c0_7 = arith.constant 0 : index
    %8 = vector.load %arg8[%c0_6, %c0_7] : memref<16x128xf32, #tpu.memory_space<vmem>>, vector<16x128xf32>
    tpu.vector_store %arg8[%c0_6, %c0_7], %7 {strides = array<i32>} : memref<16x128xf32, #tpu.memory_space<vmem>>, vector<16x128xf32>,
    %c0_i32_8 = arith.constant 0 : i32
    %9 = arith.cmpi eq, %arg2, %c0_i32_8 : i32
    %10 = arith.extui %9 : i1 to i32
    %c0_i32_9 = arith.constant 0 : i32
    %11 = arith.cmpi ne, %10, %c0_i32_9 : i32
    scf.if %11 {
      %c0_10 = arith.constant 0 : index
      %c0_11 = arith.constant 0 : index
      %12 = vector.load %arg8[%c0_10, %c0_11] : memref<16x128xf32, #tpu.memory_space<vmem>>, vector<16x128xf32>
      %c0_12 = arith.constant 0 : index
      %c0_13 = arith.constant 0 : index
      %13 = vector.load %arg5[%c0_12, %c0_13] : memref<1x128xf32, #tpu.memory_space<vmem>>, vector<1x128xf32>
      %14 = vector.broadcast %13 : vector<1x128xf32> to vector<16x128xf32>
      %15 = arith.addf %12, %14 : vector<16x128xf32>
      %cst_14 = arith.constant 5.000000e-01 : f32
      %16 = vector.broadcast %cst_14 : f32 to vector<16x128xf32>
      %17 = arith.mulf %16, %15 : vector<16x128xf32>
      %cst_15 = arith.constant 0.707106769 : f32
      %18 = vector.broadcast %cst_15 : f32 to vector<16x128xf32>
      %19 = arith.mulf %15, %18 : vector<16x128xf32>
      %20 = math.erf %19 : vector<16x128xf32>
      %cst_16 = arith.constant 1.000000e+00 : f32
      %21 = vector.broadcast %cst_16 : f32 to vector<16x128xf32>
      %22 = arith.addf %21, %20 : vector<16x128xf32>
      %23 = arith.mulf %17, %22 : vector<16x128xf32>
      %c0_17 = arith.constant 0 : index
      %c0_18 = arith.constant 0 : index
      %24 = vector.load %arg6[%c0_17, %c0_18] : memref<16x128xf32, #tpu.memory_space<vmem>>, vector<16x128xf32>
      %cst_19 = arith.constant 1.000000e+00 : f32
      %25 = vector.broadcast %cst_19 : f32 to vector<16x128xf32>
      %26 = arith.mulf %25, %24 : vector<16x128xf32>
      %27 = arith.addf %23, %26 : vector<16x128xf32>
      %c0_20 = arith.constant 0 : index
      %c0_21 = arith.constant 0 : index
      %28 = vector.load %arg7[%c0_20, %c0_21] : memref<16x128xf32, #tpu.memory_space<vmem>>, vector<16x128xf32>
      tpu.vector_store %arg7[%c0_20, %c0_21], %27 {strides = array<i32>} : memref<16x128xf32, #tpu.memory_space<vmem>>, vector<16x128xf32>,
    } else {
    }
    return
  }
  func.func @transform_0(%arg0: i32, %arg1: i32, %arg2: i32) -> (i32, i32) {
    %c0_i32 = arith.constant 0 : i32
    return %arg0, %arg2 : i32, i32
  }
  func.func @transform_1(%arg0: i32, %arg1: i32, %arg2: i32) -> (i32, i32) {
    %c0_i32 = arith.constant 0 : i32
    return %arg1, %arg2 : i32, i32
  }
  func.func @transform_2(%arg0: i32, %arg1: i32, %arg2: i32) -> (i32, i32) {
    %c0_i32 = arith.constant 0 : i32
    %c0_i32_0 = arith.constant 0 : i32
    return %c0_i32, %arg1 : i32, i32
  }
  func.func @transform_3(%arg0: i32, %arg1: i32, %arg2: i32) -> (i32, i32) {
    %c0_i32 = arith.constant 0 : i32
    return %arg0, %arg1 : i32, i32
  }
  func.func @transform_4(%arg0: i32, %arg1: i32, %arg2: i32) -> (i32, i32) {
    %c0_i32 = arith.constant 0 : i32
    return %arg0, %arg1 : i32, i32
  }
}

</mosaic_0001>

<bundles_post_ra>
// kernel: tpu_custom_call.1
= control target key start
LH: loop header
LB: loop body
LE: loop exit
PB: predicated region body
PF: predicated region fallthrough
CT: control target
= control target key end

     0   :  { %9 = vsyncpa [#allocation4], 0  ;;  %s450_s0 = inlined_call_operand.hbm [shape: f32[16,128], index: 0, kind: input, shape index: {}]   ;;  %s451_s1 = inlined_call_operand.hbm [shape: f32[128,128], index: 1, kind: input, shape index: {}]   ;;  %s452_s2 = inlined_call_operand.vmem [shape: f32[1,128], index: 2, kind: input, shape index: {}]   ;;  %s453_s3 = inlined_call_operand.hbm [shape: f32[16,128], index: 3, kind: input, shape index: {}]   ;;  %s454_s4 = inlined_call_operand.hbm [shape: f32[16,128], index: 4, kind: output, shape index: {}]  }
   0x1   :  { %10 = vsyncpa [#allocation7], 0 }
   0x2   :  { %11 = vsyncpa [#allocation5], 0  ;;  %s29_s17 = sshll.u32 %s451_s1, 4  ;;  %s374_s18 = smov [#allocation6]   ;;  %s30_s17 = int_to_ptr.hbm [resolvable:$true] %s29_s17 }
   0x3   :  { %s31_s19 = sshll.u32 %s374_s18, 4  ;;  %s16_s22 = sshll.u32 %s450_s0, 4  ;;  %s32_s19 = int_to_ptr.vmem [resolvable:$true] %s31_s19  ;;  %s17_s22 = int_to_ptr.hbm [resolvable:$true] %s16_s22 }
   0x4   :  { %s375_s23 = smov 128   ;;  %s376_s24 = smov 8  }
   0x5   :  { %37 = dma.hbm_to_vmem [thread:$0]  %s30_s17, 2048, %s32_s19, [#allocation7], %s375_s23, %s375_s23, %s376_s24  }
   0x6   :  { %s377_s25 = smov [#allocation3]   ;;  %s44_s1 = sshll.u32 %s453_s3, 4  ;;  %s45_s1 = int_to_ptr.hbm [resolvable:$true] %s44_s1 }
   0x7   :  { %s18_s26 = sshll.u32 %s377_s25, 4  ;;  %s378_s0 = smov [#allocation8]   ;;  %s19_s26 = int_to_ptr.vmem [resolvable:$true] %s18_s26 }
   0x8   :  { %24 = dma.hbm_to_vmem [thread:$0]  %s17_s22, 256, %s19_s26, [#allocation4], %s375_s23, %s375_s23, %s376_s24  }
   0x9   :  { %s46_s29 = sshll.u32 %s378_s0, 4  ;;  %s47_s29 = int_to_ptr.vmem [resolvable:$true] %s46_s29 }
   0xa   :  { %52 = dma.hbm_to_vmem [thread:$0]  %s45_s1, 256, %s47_s29, [#allocation7], %s375_s23, %s375_s23, %s376_s24  }
   0xb   :  { %368 = dma.done.wait [#allocation4], 256  }
   0xc   :  { %369 = vsyncadd [#allocation4], 4294967040 }
   0xd   :  { %370 = dma.done.wait [#allocation7], 2304  }
   0xe   :  { %371 = vsyncadd [#allocation7], 4294964992  ;;  %v90_v0 = vld [vmem:[#allocation6 + $0x78] sm:$0xff]  ;;  %v89_v1 = vld [vmem:[#allocation6 + $0x70] sm:$0xff]  ;;  %s229_s8 = sshll.u32 %s454_s4, 4  ;;  %s230_s8 = int_to_ptr.hbm [resolvable:$true] %s229_s8 }
   0xf   :  { %91 = vmatpush.xpose.msra.mxu0 %v90_v0  ;;  %245 = vmatpush.xpose.msra.mxu1 %v90_v0  ;;  %v88_v2 = vld [vmem:[#allocation6 + $0x68] sm:$0xff]  ;;  %v87_v3 = vld [vmem:[#allocation6 + $0x60] sm:$0xff]  ;;  %v86_v4 = vld [vmem:[#allocation6 + $0x58] sm:$0xff] }
  0x10   :  { %v85_v5 = vld [vmem:[#allocation6 + $0x50] sm:$0xff]  ;;  %v84_v6 = vld [vmem:[#allocation6 + $0x48] sm:$0xff]  ;;  %v83_v7 = vld [vmem:[#allocation6 + $0x40] sm:$0xff] }
  0x11   :  { %v82_v8 = vld [vmem:[#allocation6 + $0x38] sm:$0xff]  ;;  %v81_v9 = vld [vmem:[#allocation6 + $0x30] sm:$0xff]  ;;  %v80_v10 = vld [vmem:[#allocation6 + $0x28] sm:$0xff] }
  0x12   :  { %v79_v11 = vld [vmem:[#allocation6 + $0x20] sm:$0xff]  ;;  %v78_v12 = vld [vmem:[#allocation6 + $0x18] sm:$0xff]  ;;  %v77_v13 = vld [vmem:[#allocation6 + $0x10] sm:$0xff] }
  0x13   :  { %92 = vmatpush.xpose.msra.mxu0 %v89_v1  ;;  %246 = vmatpush.xpose.msra.mxu1 %v89_v1  ;;  %v76_v14 = vld [vmem:[#allocation6 + $0x8] sm:$0xff]  ;;  %v75_v15 = vld [vmem:[#allocation6] sm:$0xff]  ;;  %v73_v16 = vld [vmem:[#allocation3] sm:$0xff] }
  0x14   :  { %v74_v17 = vld [vmem:[#allocation3 + $0x8] sm:$0xff]  ;;  %v267_v18 = vld [vmem:[%s452_s2] ss:$0 sm:$0xff]  ;;  %s379_s2 = smov [#allocation9]  }
  0x15   :  { %s227_s5 = sshll.u32 %s379_s2, 4  ;;  %s228_s5 = int_to_ptr.vmem [resolvable:$true] %s227_s5 }
  0x17   :  { %93 = vmatpush.xpose.msra.mxu0 %v88_v2  ;;  %247 = vmatpush.xpose.msra.mxu1 %v88_v2 }
  0x1b   :  { %94 = vmatpush.xpose.msra.mxu0 %v87_v3  ;;  %248 = vmatpush.xpose.msra.mxu1 %v87_v3 }
  0x1f   :  { %95 = vmatpush.xpose.msra.mxu0 %v86_v4  ;;  %249 = vmatpush.xpose.msra.mxu1 %v86_v4 }
  0x23   :  { %96 = vmatpush.xpose.msra.mxu0 %v85_v5  ;;  %250 = vmatpush.xpose.msra.mxu1 %v85_v5 }
  0x27   :  { %97 = vmatpush.xpose.msra.mxu0 %v84_v6  ;;  %251 = vmatpush.xpose.msra.mxu1 %v84_v6 }
  0x2b   :  { %98 = vmatpush.xpose.msra.mxu0 %v83_v7  ;;  %252 = vmatpush.xpose.msra.mxu1 %v83_v7 }
  0x2f   :  { %99 = vmatpush.xpose.msra.mxu0 %v82_v8  ;;  %253 = vmatpush.xpose.msra.mxu1 %v82_v8 }
  0x33   :  { %100 = vmatpush.xpose.msra.mxu0 %v81_v9  ;;  %254 = vmatpush.xpose.msra.mxu1 %v81_v9 }
  0x37   :  { %101 = vmatpush.xpose.msra.mxu0 %v80_v10  ;;  %255 = vmatpush.xpose.msra.mxu1 %v80_v10 }
  0x3b   :  { %102 = vmatpush.xpose.msra.mxu0 %v79_v11  ;;  %256 = vmatpush.xpose.msra.mxu1 %v79_v11 }
  0x3f   :  { %103 = vmatpush.xpose.msra.mxu0 %v78_v12  ;;  %257 = vmatpush.xpose.msra.mxu1 %v78_v12 }
  0x43   :  { %104 = vmatpush.xpose.msra.mxu0 %v77_v13  ;;  %258 = vmatpush.xpose.msra.mxu1 %v77_v13 }
  0x47   :  { %105 = vmatpush.xpose.msra.mxu0 %v76_v14  ;;  %259 = vmatpush.xpose.msra.mxu1 %v76_v14 }
  0x4b   :  { %106 = vmatpush.xpose.msra.mxu0 %v75_v15  ;;  %260 = vmatpush.xpose.msra.mxu1 %v75_v15 }
  0x4e   :  { %107 = vmatmul.f32.vlgmr.msra.gmra.mxu0 %v73_v16  ;;  %110 = vmatmul.f32.vlgmr.msra.gmra.mxu1 %v74_v17 }
  0xcb   :  { %v108_v19 = vpop.f32.mrf.mxu0  ;;  %v111_v20 = vpop.f32.mrf.mxu1 }
  0xcc   :  { %v426_v21 = vadd.f32 %v267_v18, %v108_v19  ;;  %v428_v22 = vadd.f32 %v267_v18, %v111_v20 }
  0xce   :  { %v431_v23 = vmul.f32 0.70710677, %v426_v21  ;;  %v434_v24 = vmul.f32 0.70710677, %v428_v22 }
  0xd0   :  { %v133_v25 = vmul.f32 %v431_v23, %v431_v23  ;;  %v173_v26 = vmul.f32 %v434_v24, %v434_v24 }
  0xd2   :  { %v134_v27 = vmin.f32 %v133_v25, 16.0  ;;  %v174_v28 = vmin.f32 %v173_v26, 16.0 }
  0xd4   :  { %v135_v29 = vmul.f32 2.1237322e-06, %v134_v27  ;;  %v146_v30 = vmul.f32 3.8918573e-05, %v134_v27  ;;  %v175_v31 = vmul.f32 2.1237322e-06, %v174_v28 }
  0xd5   :  { %v186_v32 = vmul.f32 3.8918573e-05, %v174_v28 }
  0xd6   :  { %v136_v33 = vadd.f32 0.00028619796, %v135_v29  ;;  %v147_v34 = vadd.f32 0.001143296, %v146_v30  ;;  %v176_v35 = vadd.f32 0.00028619796, %v175_v31 }
  0xd7   :  { %v187_v36 = vadd.f32 0.001143296, %v186_v32 }
  0xd8   :  { %v137_v37 = vmul.f32 %v136_v33, %v134_v27  ;;  %v148_v38 = vmul.f32 %v147_v34, %v134_v27  ;;  %v177_v39 = vmul.f32 %v176_v35, %v174_v28  ;;  %v129_v35 = vmul.f32 0.5, %v426_v21 }
  0xd9   :  { %v188_v40 = vmul.f32 %v187_v36, %v174_v28 }
  0xda   :  { %v138_v41 = vadd.f32 0.0036580483, %v137_v37  ;;  %v149_v42 = vadd.f32 0.014752088, %v148_v38  ;;  %v178_v45 = vadd.f32 0.0036580483, %v177_v39 }
  0xdb   :  { %v189_v43 = vadd.f32 0.014752088, %v188_v40  ;;  %v217_v37 = vld [vmem:[#allocation8] sm:$0xff]  ;;  %v218_v40 = vld [vmem:[#allocation8 + $0x8] sm:$0xff] }
  0xdc   :  { %v150_v44 = vmul.f32 %v149_v42, %v134_v27  ;;  %v139_v47 = vmul.f32 %v138_v41, %v134_v27  ;;  %v179_v51 = vmul.f32 %v178_v45, %v174_v28 }
  0xdd   :  { %v190_v46 = vmul.f32 %v189_v43, %v174_v28 }
  0xde   :  { %v151_v48 = vadd.f32 0.112945676, %v150_v44  ;;  %v140_v53 = vadd.f32 0.05243302, %v139_v47  ;;  %v180_v57 = vadd.f32 0.05243302, %v179_v51 }
  0xdf   :  { %v191_v49 = vadd.f32 0.112945676, %v190_v46 }
  0xe0   :  { %v152_v50 = vmul.f32 %v151_v48, %v134_v27  ;;  %v141_v59 = vmul.f32 %v140_v53, %v134_v27  ;;  %v181_v62 = vmul.f32 %v180_v57, %v174_v28 }
  0xe1   :  { %v192_v52 = vmul.f32 %v191_v49, %v174_v28 }
  0xe2   :  { %v153_v54 = vadd.f32 0.4994258, %v152_v50  ;;  %v142_v63 = vadd.f32 0.18741608, %v141_v59  ;;  %v182_v0 = vadd.f32 0.18741608, %v181_v62 }
  0xe3   :  { %v193_v55 = vadd.f32 0.4994258, %v192_v52 }
  0xe4   :  { %v154_v56 = vmul.f32 %v153_v54, %v134_v27  ;;  %v143_v2 = vmul.f32 %v142_v63, %v134_v27  ;;  %v183_v5 = vmul.f32 %v182_v0, %v174_v28 }
  0xe5   :  { %v194_v58 = vmul.f32 %v193_v55, %v174_v28 }
  0xe6   :  { %v155_v60 = vadd.f32 1.0, %v154_v56  ;;  %v144_v8 = vadd.f32 1.1283791, %v143_v2  ;;  %v184_v14 = vadd.f32 1.1283791, %v183_v5 }
  0xe7   :  { %v195_v61 = vadd.f32 1.0, %v194_v58 }
  0xe8   :  { %268 = vrcp.f32 %v155_v60  ;;  %v167_v9 = vand.u32 2147483648, %v155_v60  ;;  %v165_v12 = vand.u32 2147483647, %v155_v60  ;;  %vm161_vm2 = vweird.f32 %v155_v60 }
  0xe9   :  { %270 = vrcp.f32 %v195_v61  ;;  %v207_v13 = vand.u32 2147483648, %v195_v61  ;;  %v205_v16 = vand.u32 2147483647, %v195_v61  ;;  %vm201_vm4 = vweird.f32 %v195_v61 }
  0xea   :  { %v168_v18 = vor.u32 1.1754944e-38, %v167_v9  ;;  %v145_v20 = vmul.f32 %v144_v8, %v431_v23  ;;  %vm166_vm5 = vcmp.eq.f32.partialorder %v165_v12, 8.507059e+37  ;;  %v185_v28 = vmul.f32 %v184_v14, %v434_v24 }
  0xeb   :  { %v208_v26 = vor.u32 1.1754944e-38, %v207_v13  ;;  %vm206_vm7 = vcmp.eq.f32.partialorder %v205_v16, 8.507059e+37  ;;  %v130_v23 = vmul.f32 0.5, %v428_v22 }
  0xee   :  { %v269_v1 = vpop.eup %268 }
  0xef   :  { %v271_v3 = vpop.eup %270  ;;  %v157_v4 = vmul.f32 %v269_v1, %v155_v60  ;;  %vm162_vm0 = vweird.f32 %v269_v1 }
  0xf0   :  { %v197_v6 = vmul.f32 %v271_v3, %v195_v61  ;;  %vm202_vm1 = vweird.f32 %v271_v3  ;;  %vm163_vm3 = vmor %vm161_vm2, %vm162_vm0 }
  0xf1   :  { %v158_v7 = vsub.f32 1.0, %v157_v4  ;;  %vm203_vm6 = vmor %vm201_vm4, %vm202_vm1 }
  0xf2   :  { %v198_v10 = vsub.f32 1.0, %v197_v6 }
  0xf3   :  { %v159_v11 = vmul.f32 %v269_v1, %v158_v7 }
  0xf4   :  { %v199_v15 = vmul.f32 %v271_v3, %v198_v10 }
  0xf5   :  { %v160_v17 = vadd.f32 %v269_v1, %v159_v11 }
  0xf6   :  { %v200_v19 = vadd.f32 %v271_v3, %v199_v15 }
  0xf7   :  { %v164_v25 = vsel %vm163_vm3, %v269_v1, %v160_v17 }
  0xf8   :  { %v169_v27 = vsel %vm166_vm5, %v168_v18, %v164_v25  ;;  %v204_v29 = vsel %vm203_vm6, %v271_v3, %v200_v19 }
  0xf9   :  { %v170_v30 = vmul.f32 %v169_v27, %v145_v20  ;;  %v209_v31 = vsel %vm206_vm7, %v208_v26, %v204_v29 }
  0xfa   :  { %v210_v32 = vmul.f32 %v209_v31, %v185_v28 }
  0xfb   :  { %v243_v33 = vclamps-f32 %v170_v30, 1.0 }
  0xfc   :  { %v244_v34 = vclamps-f32 %v210_v32, 1.0 }
  0xfd   :  { %v213_v36 = vadd.f32 1.0, %v243_v33 }
  0xfe   :  { %v214_v38 = vadd.f32 1.0, %v244_v34 }
  0xff   :  { %v215_v39 = vmul.f32 %v213_v36, %v129_v35 }
 0x100   :  { %v216_v24 = vmul.f32 %v214_v38, %v130_v23 }
 0x101   :  { %v219_v41 = vadd.f32 %v217_v37, %v215_v39 }
 0x102   :  { %v220_v42 = vadd.f32 %v218_v40, %v216_v24 }
 0x103   :  { %221 = vst [vmem:[#allocation9] sm:$0xff] %v219_v41 }
 0x104   :  { %222 = vst [vmem:[#allocation9 + $0x8] sm:$0xff] %v220_v42 }
 0x105   :  { %235 = dma.vmem_to_hbm [thread:$0]  %s228_s5, 256, %s230_s8, [#allocation5], %s375_s23, %s375_s23, %s376_s24  }
 0x106   :  { %372 = dma.done.wait [#allocation5], 256  }
 0x107   :  { %373 = vsyncadd [#allocation5], 4294967040 }
 0x108   :  { %240 = vsyncpa [#allocation4], 1 }
 0x109   :  { %241 = vsyncpa [#allocation7], 1 }
 0x10a   :  { %242 = vsyncpa [#allocation5], 1 }

</bundles_post_ra>
